<compile_context>
chip_gen: v5e
topology: v5e:2x2
jax: 0.10.0
libtpu: 0.0.40
codegen_flags: <defaults>
</compile_context>

<pallas_src>
import jax
import jax.numpy as jnp
from jax.experimental import pallas as pl
from jax.experimental.pallas import tpu as pltpu


def _round_up(x, m):
    return (x + m - 1) // m * m


def ssmast_head_kernel(pooled_ref, w_ref, b_ref, out_ref):
    """Fused (patch-embed + linear head) projection on pooled patch features.

    pooled_ref : (TB, P)    mean-pooled within-patch features (P = patch*patch)
    w_ref      : (P, Dpad)  folded weight  Wp @ Wfc  (zero-padded to 128 lanes)
    b_ref      : (1, Dpad)  folded bias    bp @ Wfc + bfc
    out_ref    : (TB, Dpad)
    """
    p = pooled_ref[...]
    if p.dtype != jnp.float32:
        p = p.astype(jnp.float32)
    # Single MXU pass (K = P = 16 -> one pipelined pass; HBM/overhead bound).
    y = jnp.dot(p, w_ref[...], preferred_element_type=jnp.float32)
    out_ref[...] = (y + b_ref[...]).astype(out_ref.dtype)


def ssmast_forward(x, params, *, patch=4):
    """x: (B, 1, H, W) NCHW spectrogram.  Returns (B, out_dim) float32."""
    B, C, H, W = x.shape
    assert C == 1 and H % patch == 0 and W % patch == 0

    # --- pooling hoisted to the wrapper (dominant HBM-traffic win) ---
    # mean_N(patches)[b, i*patch + j] == mean over the patch grid of
    # x[b, 0, hp*patch + i, wp*patch + j]; exact because pooling commutes with
    # the linear patch embedding.  One streaming reduce over x, no (B, N, P)
    # intermediate ever hits HBM.
    Hp, Wp = H // patch, W // patch
    pooled = jnp.mean(
        x.reshape(B, Hp, patch, Wp, patch).astype(jnp.float32), axis=(1, 3)
    ).reshape(B, patch * patch)                                     # (B, P)

    wp, bp, wfc, bfc = (params["w_patch"], params["b_patch"],
                        params["w_fc1"], params["b_fc1"])
    P = patch * patch
    E, D = wfc.shape

    # Fold the two linears (static weights; folded once by XLA, not per step):
    #   mean_N(patches @ Wp + bp) @ Wfc + bfc
    # = mean_N(patches) @ (Wp @ Wfc) + (bp @ Wfc + bfc)
    w_comb = jnp.dot(wp.astype(jnp.float32), wfc.astype(jnp.float32))        # (P, D)
    b_comb = jnp.dot(bp.astype(jnp.float32), wfc.astype(jnp.float32)) + bfc  # (1, D)

    # Lane-dense output: pad out_dim to a multiple of 128, slice afterwards.
    Dpad = _round_up(D, 128)
    if Dpad != D:
        w_comb = jnp.pad(w_comb, ((0, 0), (0, Dpad - D)))
        b_comb = jnp.pad(b_comb, ((0, 0), (0, Dpad - D)))

    # Grid: input is (B, 16) f32 -> VMEM is trivially fine for any tile.
    # Use 2 "parallel" batch steps when B % 16 == 0 (TB multiple of 8) so the
    # second TensorCore on v7x gets work; otherwise a single fat step (the
    # kernel is pure per-step overhead at these sizes).
    if B % 16 == 0:
        TB = B // 2
    else:
        TB = B
    grid = (B // TB,)

    flops = 2 * B * P * Dpad
    bytes_accessed = 4 * (B * P + P * Dpad + Dpad + B * Dpad)

    out = pl.pallas_call(
        ssmast_head_kernel,
        out_shape=jax.ShapeDtypeStruct((B, Dpad), jnp.float32),
        grid=grid,
        in_specs=[
            pl.BlockSpec((TB, P), lambda i: (i, 0)),
            pl.BlockSpec((P, Dpad), lambda i: (0, 0)),
            pl.BlockSpec((1, Dpad), lambda i: (0, 0)),
        ],
        out_specs=pl.BlockSpec((TB, Dpad), lambda i: (i, 0)),
        compiler_params=pltpu.CompilerParams(
            dimension_semantics=("parallel",)),
        cost_estimate=pl.CostEstimate(
            flops=flops, transcendentals=0, bytes_accessed=bytes_accessed),
    )(pooled, w_comb, b_comb)

    return out[:, :D]


def init_params(key, *, patch_dim, emb_dim, out_dim):
    """Deterministic synthetic parameters (no checkpoint loading)."""
    k1, k2, k3, k4 = jax.random.split(key, 4)
    # fc1 matches torch.nn.Linear(emb_dim, out_dim): weight (out, in), bias (out,)
    w_fc1_torch = jax.random.normal(k1, (out_dim, emb_dim), jnp.float32) * 0.02
    b_fc1_torch = jax.random.normal(k2, (out_dim,), jnp.float32) * 0.02
    return {
        "w_patch": jax.random.normal(k3, (patch_dim, emb_dim), jnp.float32) * 0.02,
        "b_patch": jax.random.normal(k4, (1, emb_dim), jnp.float32) * 0.02,
        "w_fc1": w_fc1_torch.T,                 # (emb_dim, out_dim) for x @ W.T
        "b_fc1": b_fc1_torch.reshape(1, out_dim),
    }


if __name__ == "__main__":
    key = jax.random.PRNGKey(0)
    kx, kp = jax.random.split(key)

    # Small shapes: batch=2, 1-channel 16x16 spectrogram, patch=4 -> 16 patches
    # of dim 16; emb_dim=32, out_dim=64 (per config['pretrain']['base_encoder']).
    B, H, W = 2, 16, 16
    patch = 4
    emb_dim, out_dim = 32, 64

    x = jax.random.normal(kx, (B, 1, H, W), jnp.float32)
    params = init_params(kp, patch_dim=patch * patch,
                         emb_dim=emb_dim, out_dim=out_dim)

    y = ssmast_forward(x, params, patch=patch)
    jax.block_until_ready(y)

    # Pure-JAX reference of the ORIGINAL (unfused) math:
    #   patchify -> linear patch embed -> mean pool over patches -> fc1.
    xp = x.reshape(B, H // patch, patch, W // patch, patch)
    xp = jnp.transpose(xp, (0, 1, 3, 2, 4)).reshape(B, -1, patch * patch)
    z_ref = jnp.mean(jnp.einsum("bnp,pe->bne", xp, params["w_patch"])
                     + params["b_patch"][None], axis=1)
    y_ref = z_ref @ params["w_fc1"] + params["b_fc1"]
    assert y.shape == (B, out_dim)
    assert jnp.allclose(y, y_ref, atol=1e-4, rtol=1e-4)

    print("KERNEL_OK")
</pallas_src>

<mosaic_0001>
module attributes {stable_mosaic.version = 11 : i64} {
  func.func @ssmast_head_kernel(%arg0: i32, %arg1: memref<2x16xf32, #tpu.memory_space<vmem>>, %arg2: memref<16x128xf32, #tpu.memory_space<vmem>>, %arg3: memref<1x128xf32, #tpu.memory_space<vmem>>, %arg4: memref<2x128xf32, #tpu.memory_space<vmem>>) attributes {dimension_semantics = [#tpu.dimension_semantics<parallel>], iteration_bounds = array<i64: 1>, scalar_prefetch = 0 : i64, scratch_operands = 0 : i64, tpu.core_type = #tpu.core_type<tc>, window_params = [{transform_indices = @transform_0, window_bounds = array<i64: 2, 16>}, {pipeline_mode = #tpu.pipeline_mode<synchronous>, transform_indices = @transform_1, window_bounds = array<i64: 16, 128>}, {pipeline_mode = #tpu.pipeline_mode<synchronous>, transform_indices = @transform_2, window_bounds = array<i64: 1, 128>}, {transform_indices = @transform_3, window_bounds = array<i64: 2, 128>}]} {
    %c0 = arith.constant 0 : index
    %c0_0 = arith.constant 0 : index
    %0 = vector.load %arg1[%c0, %c0_0] : memref<2x16xf32, #tpu.memory_space<vmem>>, vector<2x16xf32>
    %c0_1 = arith.constant 0 : index
    %c0_2 = arith.constant 0 : index
    %1 = vector.load %arg2[%c0_1, %c0_2] : memref<16x128xf32, #tpu.memory_space<vmem>>, vector<16x128xf32>
    %cst = arith.constant dense<0.000000e+00> : vector<2x128xf32>
    %2 = tpu.matmul %0, %1, %cst {dimension_numbers = #tpu.dot_dimension_numbers<[1], [0], [0], [1], [0, 0, 1, 1], [], []>} : vector<2x16xf32>, vector<16x128xf32>, vector<2x128xf32> -> vector<2x128xf32>
    %c0_3 = arith.constant 0 : index
    %c0_4 = arith.constant 0 : index
    %3 = vector.load %arg3[%c0_3, %c0_4] : memref<1x128xf32, #tpu.memory_space<vmem>>, vector<1x128xf32>
    %4 = vector.broadcast %3 : vector<1x128xf32> to vector<2x128xf32>
    %5 = arith.addf %2, %4 : vector<2x128xf32>
    %c0_5 = arith.constant 0 : index
    %c0_6 = arith.constant 0 : index
    %6 = vector.load %arg4[%c0_5, %c0_6] : memref<2x128xf32, #tpu.memory_space<vmem>>, vector<2x128xf32>
    tpu.vector_store %arg4[%c0_5, %c0_6], %5 {strides = array<i32>} : memref<2x128xf32, #tpu.memory_space<vmem>>, vector<2x128xf32>,
    return
  }
  func.func @transform_0(%arg0: i32) -> (i32, i32) {
    %c0_i32 = arith.constant 0 : i32
    %c0_i32_0 = arith.constant 0 : i32
    return %arg0, %c0_i32 : i32, i32
  }
  func.func @transform_1(%arg0: i32) -> (i32, i32) {
    %c0_i32 = arith.constant 0 : i32
    %c0_i32_0 = arith.constant 0 : i32
    %c0_i32_1 = arith.constant 0 : i32
    return %c0_i32, %c0_i32_0 : i32, i32
  }
  func.func @transform_2(%arg0: i32) -> (i32, i32) {
    %c0_i32 = arith.constant 0 : i32
    %c0_i32_0 = arith.constant 0 : i32
    %c0_i32_1 = arith.constant 0 : i32
    return %c0_i32, %c0_i32_0 : i32, i32
  }
  func.func @transform_3(%arg0: i32) -> (i32, i32) {
    %c0_i32 = arith.constant 0 : i32
    %c0_i32_0 = arith.constant 0 : i32
    return %arg0, %c0_i32 : i32, i32
  }
}

</mosaic_0001>

<bundles_post_ra>
// kernel: tpu_custom_call.1
= control target key start
LH: loop header
LB: loop body
LE: loop exit
PB: predicated region body
PF: predicated region fallthrough
CT: control target
= control target key end

     0   :  { %8 = vsyncpa [#allocation3], 0  ;;  %s217_s0 = inlined_call_operand.hbm [shape: f32[2,16], index: 0, kind: input, shape index: {}]   ;;  %s218_s1 = inlined_call_operand.hbm [shape: f32[16,128], index: 1, kind: input, shape index: {}]   ;;  %s219_s2 = inlined_call_operand.vmem [shape: f32[1,128], index: 2, kind: input, shape index: {}]   ;;  %s220_s3 = inlined_call_operand.hbm [shape: f32[2,128], index: 3, kind: output, shape index: {}]  }
   0x1   :  { %9 = vsyncpa [#allocation6], 0 }
   0x2   :  { %10 = vsyncpa [#allocation4], 0  ;;  %s16_s14 = sshll.u32 %s217_s0, 4  ;;  %s180_s15 = smov [#allocation2]   ;;  %s17_s14 = int_to_ptr.hbm [resolvable:$true] %s16_s14 }
   0x3   :  { %s18_s16 = sshll.u32 %s180_s15, 4  ;;  %s26_s19 = sshll.u32 %s218_s1, 4  ;;  %s19_s16 = int_to_ptr.vmem [resolvable:$true] %s18_s16  ;;  %s27_s19 = int_to_ptr.hbm [resolvable:$true] %s26_s19 }
   0x4   :  { %21 = dma.hbm_to_vmem [thread:$0]  %s17_s14, 32, %s19_s16, [#allocation3]  }
   0x5   :  { %s181_s20 = smov [#allocation5]   ;;  %s182_s22 = smov 128  }
   0x6   :  { %s28_s21 = sshll.u32 %s181_s20, 4  ;;  %s183_s23 = smov 8   ;;  %s29_s21 = int_to_ptr.vmem [resolvable:$true] %s28_s21 }
   0x7   :  { %34 = dma.hbm_to_vmem [thread:$0]  %s27_s19, 256, %s29_s21, [#allocation6], %s182_s22, %s182_s22, %s183_s23  }
   0x8   :  { %174 = dma.done.wait [#allocation3], 32  }
   0x9   :  { %175 = vsyncadd [#allocation3], 4294967264 }
   0xa   :  { %176 = dma.done.wait [#allocation6], 256  }
   0xb   :  { %177 = vsyncadd [#allocation6], 4294967040  ;;  %v47_v0 = vld [vmem:[#allocation5 + $0x8] sm:$0xff]  ;;  %v46_v1 = vld [vmem:[#allocation5] sm:$0xff]  ;;  %vm52_vm0 = vcmask 130048   ;;  %s184_s24 = smov [#allocation7]  }
   0xc   :  { %70 = vmatpush.msra.mxu0 %v47_v0  ;;  %v45_v2 = vld [vmem:[#allocation2] sm:$0x3]  ;;  %s82_s25 = sshll.u32 %s184_s24, 4  ;;  %s84_s28 = sshll.u32 %s220_s3, 4  ;;  %s83_s25 = int_to_ptr.vmem [resolvable:$true] %s82_s25  ;;  %s85_s28 = int_to_ptr.hbm [resolvable:$true] %s84_s28 }
   0xd   :  { %v101_v3 = vld [vmem:[%s219_s2] ss:$0 sm:$0xff] }
   0xe   :  { %71 = vmatpush.msra.mxu0 %v46_v1 }
   0xf   :  { %95 = vmatmul.msk.f32.vlgmr.msra.gmra.mxu0 %vm52_vm0, %v45_v2 }
  0x8c   :  { %v73_v4 = vpop.f32.mrf.mxu0 }
  0x8d   :  { %v74_v5 = vadd.f32 %v101_v3, %v73_v4 }
  0x8f   :  { %76 = vst [vmem:[#allocation7] sm:$0x3] %v74_v5 }
  0x90   :  { %87 = dma.vmem_to_hbm [thread:$0]  %s83_s25, 32, %s85_s28, [#allocation4]  }
  0x91   :  { %178 = dma.done.wait [#allocation4], 32  }
  0x92   :  { %179 = vsyncadd [#allocation4], 4294967264 }
  0x93   :  { %92 = vsyncpa [#allocation3], 1 }
  0x94   :  { %93 = vsyncpa [#allocation6], 1 }
  0x95   :  { %94 = vsyncpa [#allocation4], 1 }

</bundles_post_ra>
